<compile_context>
chip_gen: v7x
topology: tpu7x:2x2x1
jax: 0.10.0
libtpu: 0.0.40
codegen_flags: <defaults>
</compile_context>

<pallas_src>
import functools

import jax
import jax.numpy as jnp
from jax.experimental import pallas as pl
from jax.experimental.pallas import tpu as pltpu


def _focal_loss_kernel(x_ref, t_ref, out_ref, *, gamma, alpha, valid_rows,
                       mask_rows):
    # x_ref: (1, C, tr, 128) logits block; t_ref: (1, tr, 128) int labels.
    c_dim = x_ref.shape[1]
    tr = t_ref.shape[1]

    t = t_ref[0]                                     # (tr, 128) int32

    def xc(c):
        # Re-read the resident VMEM block per use instead of caching C full
        # (tr,128) f32 temporaries (saves vreg/VMEM pressure; vld is cheap).
        return x_ref[0, c].astype(jnp.float32)

    # Numerically stable log-softmax over the class axis, statically unrolled
    # over C so everything stays elementwise on the VPU (no cross-lane XLU).
    # NOTE: for very large class counts (C >~ 32) a lax.fori_loop would bound
    # live-range growth; typical segmentation C is small so unroll is best.
    m = xc(0)
    for c in range(1, c_dim):
        m = jnp.maximum(m, xc(c))

    s = None                                         # sum_c exp(x_c - m)
    z_t = jnp.zeros_like(m)                          # (x_t - m), selected
    e_t = jnp.zeros_like(m)                          # exp(x_t - m), selected
    for c in range(c_dim):
        zc = xc(c) - m
        ec = jnp.exp(zc)
        s = ec if s is None else s + ec
        is_c = t == c
        z_t = jnp.where(is_c, zc, z_t)
        e_t = jnp.where(is_c, ec, e_t)

    lse = jnp.log(s)
    ce = lse - z_t                                   # nll_loss, reduction='none'
    pt = e_t / s                                     # softmax at target (no 2nd exp;
                                                     # pl.reciprocal(s, approx=True)
                                                     # is a v7x EUP-trim option)
    omp = jnp.maximum(1.0 - pt, 0.0)                 # clamp 1-ulp overshoot

    # Focal weight: integer gamma -> repeated multiply (avoids exp/log power
    # on the single EUP slot); general gamma falls back to jnp.power.
    g = float(gamma)
    if g == int(g) and 0 <= int(g) <= 8:
        gi = int(g)
        if gi == 0:
            focal_w = jnp.ones_like(omp)
        else:
            focal_w = omp
            for _ in range(gi - 1):
                focal_w = focal_w * omp
    else:
        focal_w = jnp.power(omp, g)

    w = focal_w * ce
    if alpha is not None:
        # TODO(synk): the original PyTorch code writes float alpha values into
        # an integer ones_like(targets) tensor (silently truncating them to 0);
        # we implement the clearly intended float alpha weighting instead.
        aw = jnp.where(t == 1, jnp.float32(alpha),
                       jnp.where(t == 0, jnp.float32(1.0 - alpha),
                                 jnp.float32(1.0)))
        w = aw * w

    # Validity: out-of-range labels (including the padding sentinel == C)
    # never contribute; ragged-tail tiles additionally mask rows past the
    # true end (their DMA'd contents are unspecified, so select — never
    # multiply — to keep possible NaN garbage out of the sum).
    valid = jnp.logical_and(t >= 0, t < c_dim)
    if mask_rows:
        row_id = (pl.program_id(1) * tr
                  + jax.lax.broadcasted_iota(jnp.int32, (tr, 128), 0))
        valid = jnp.logical_and(valid, row_id < valid_rows)

    loss = jnp.where(valid, w, jnp.float32(0.0))     # (tr, 128)

    # Per-tile partial kept vreg-shaped (8,128): reducing whole 8-row vreg
    # groups is pure elementwise VPU adds (no XLU, no scalar stores).
    out_ref[0] = jnp.sum(loss.reshape(tr // 8, 8, 128), axis=0)


def focal_loss(inputs, targets, gamma=2.0, alpha=0.25, size_average=True,
               target_block_bytes=2 * 1024 * 1024):
    """inputs: [B, C, H, W] float logits; targets: [B, H, W] int class ids."""
    b, c, h, w = inputs.shape
    lanes = 128
    hw = h * w
    n = b * hw

    t_int = targets.astype(jnp.int32)

    if hw % lanes == 0:
        # Fast path (common segmentation shapes): NCHW reshapes *for free* to
        # (B, C, HW/128, 128) — no transpose, no extra HBM pass.
        rows = hw // lanes
        x4 = inputs.reshape(b, c, rows, lanes)
        t3 = t_int.reshape(b, rows, lanes)
        rows_eff = rows
        if rows % 8 != 0:
            # Rare (tiny images): pad rows up to a sublane multiple; padded
            # pixels carry sentinel label == C so the kernel zeroes them.
            rows_eff = pl.cdiv(rows, 8) * 8
            x4 = jnp.pad(x4, ((0, 0), (0, 0), (0, rows_eff - rows), (0, 0)))
            t3 = jnp.pad(t3, ((0, 0), (0, rows_eff - rows), (0, 0)),
                         constant_values=c)
        b_eff = b
    else:
        # Fallback (HW not lane-aligned): one B<->C transpose + pad, then the
        # exact same kernel with an effective batch of 1.
        rows_eff = max(8, pl.cdiv(pl.cdiv(n, lanes), 8) * 8)
        n_pad = rows_eff * lanes
        x2 = jnp.transpose(inputs, (1, 0, 2, 3)).reshape(c, n)
        x2 = jnp.pad(x2, ((0, 0), (0, n_pad - n)))
        t1 = jnp.pad(t_int.reshape(n), (0, n_pad - n), constant_values=c)
        x4 = x2.reshape(1, c, rows_eff, lanes)
        t3 = t1.reshape(1, rows_eff, lanes)
        b_eff = 1

    # VMEM-budgeted row tile (multiple of 8 sublanes); ~2 MiB of logits per
    # tile double-buffers comfortably under every generation's scoped-VMEM
    # default (v5e 16 MiB, v6e/v7x 32 MiB).
    itemsize = x4.dtype.itemsize
    tr = max(8, (target_block_bytes // (c * lanes * itemsize)) // 8 * 8)
    tr = min(tr, rows_eff)
    n_tiles = pl.cdiv(rows_eff, tr)
    mask_rows = (rows_eff % tr) != 0

    kernel = functools.partial(
        _focal_loss_kernel,
        gamma=float(gamma),
        alpha=None if alpha is None else float(alpha),
        valid_rows=rows_eff,
        mask_rows=mask_rows,
    )

    n_total = b_eff * rows_eff * lanes
    cost = pl.CostEstimate(
        flops=(5 * c + 15) * n_total,
        transcendentals=(c + 1) * n_total,
        bytes_accessed=(c * itemsize + 4) * n_total
        + b_eff * n_tiles * 8 * lanes * 4,
    )

    partials = pl.pallas_call(
        kernel,
        out_shape=jax.ShapeDtypeStruct((b_eff, n_tiles * 8, lanes),
                                       jnp.float32),
        grid=(b_eff, n_tiles),
        in_specs=[
            pl.BlockSpec((1, c, tr, lanes), lambda bi, i: (bi, 0, i, 0)),
            pl.BlockSpec((1, tr, lanes), lambda bi, i: (bi, i, 0)),
        ],
        out_specs=pl.BlockSpec((1, 8, lanes), lambda bi, i: (bi, i, 0)),
        compiler_params=pltpu.CompilerParams(
            dimension_semantics=("parallel", "parallel")),
        cost_estimate=cost,
    )(x4, t3)

    # Tiny final reduction + mean scale outside the kernel (keeps both grid
    # axes fully parallel across TensorCores, better summation accuracy).
    total = jnp.sum(partials)
    if size_average:
        return total / jnp.float32(n)
    return total


def _focal_loss_ref(inputs, targets, gamma=2.0, alpha=0.25, size_average=True):
    """Pure-JAX reference mirroring the PyTorch forward (intended float alpha)."""
    c = inputs.shape[1]
    x = jnp.transpose(inputs, (0, 2, 3, 1)).reshape(-1, c).astype(jnp.float32)
    t = targets.reshape(-1).astype(jnp.int32)
    logp = jax.nn.log_softmax(x, axis=1)
    ce = -jnp.take_along_axis(logp, t[:, None], axis=1)[:, 0]
    pt = jnp.exp(-ce)
    fw = (1.0 - pt) ** gamma
    if alpha is not None:
        aw = jnp.where(t == 1, alpha, jnp.where(t == 0, 1.0 - alpha, 1.0))
        fw = aw * fw
    loss = fw * ce
    return loss.mean() if size_average else loss.sum()


if __name__ == "__main__":
    key = jax.random.PRNGKey(0)
    k1, k2, k3, k4 = jax.random.split(key, 4)

    # Lane-aligned fast (transpose-free) path: B=2, C=4, H=W=16 (HW=256).
    B, C, H, W = 2, 4, 16, 16
    logits = jax.random.normal(k1, (B, C, H, W), dtype=jnp.float32)
    targets = jax.random.randint(k2, (B, H, W), 0, C, dtype=jnp.int32)

    out = jax.block_until_ready(
        focal_loss(logits, targets, gamma=2.0, alpha=0.25, size_average=True))
    ref = _focal_loss_ref(logits, targets, gamma=2.0, alpha=0.25,
                          size_average=True)
    if not jnp.allclose(out, ref, rtol=1e-5, atol=1e-6):
        raise AssertionError(f"mismatch(mean): pallas={out} ref={ref}")

    # Sum-reduction path.
    out_sum = jax.block_until_ready(
        focal_loss(logits, targets, gamma=2.0, alpha=0.25, size_average=False))
    ref_sum = _focal_loss_ref(logits, targets, gamma=2.0, alpha=0.25,
                              size_average=False)
    if not jnp.allclose(out_sum, ref_sum, rtol=1e-5, atol=1e-5):
        raise AssertionError(f"mismatch(sum): pallas={out_sum} ref={ref_sum}")

    # Non-lane-aligned fallback path: H=W=10 (HW=100 -> transpose + pad).
    Hf, Wf = 10, 10
    logits_f = jax.random.normal(k3, (B, C, Hf, Wf), dtype=jnp.float32)
    targets_f = jax.random.randint(k4, (B, Hf, Wf), 0, C, dtype=jnp.int32)
    out_f = jax.block_until_ready(focal_loss(logits_f, targets_f))
    ref_f = _focal_loss_ref(logits_f, targets_f)
    if not jnp.allclose(out_f, ref_f, rtol=1e-5, atol=1e-6):
        raise AssertionError(f"mismatch(fallback): pallas={out_f} ref={ref_f}")

    print("KERNEL_OK")
</pallas_src>

<mosaic_0001>
module attributes {stable_mosaic.version = 11 : i64} {
  func.func @_focal_loss_kernel(%arg0: i32, %arg1: i32, %arg2: memref<1x4x8x128xf32, #tpu.memory_space<vmem>>, %arg3: memref<1x8x128xi32, #tpu.memory_space<vmem>>, %arg4: memref<1x8x128xf32, #tpu.memory_space<vmem>>) attributes {dimension_semantics = [#tpu.dimension_semantics<parallel>, #tpu.dimension_semantics<parallel>], iteration_bounds = array<i64: 2, 1>, scalar_prefetch = 0 : i64, scratch_operands = 0 : i64, tpu.core_type = #tpu.core_type<tc>, window_params = [{transform_indices = @transform_0, window_bounds = array<i64: 1, 4, 8, 128>}, {transform_indices = @transform_1, window_bounds = array<i64: 1, 8, 128>}, {transform_indices = @transform_2, window_bounds = array<i64: 1, 8, 128>}]} {
    %c0 = arith.constant 0 : index
    %c0_0 = arith.constant 0 : index
    %c0_1 = arith.constant 0 : index
    %0 = vector.load %arg3[%c0, %c0_0, %c0_1] : memref<1x8x128xi32, #tpu.memory_space<vmem>>, vector<1x8x128xi32>
    %1 = vector.shape_cast %0 : vector<1x8x128xi32> to vector<8x128xi32>
    %c0_2 = arith.constant 0 : index
    %c0_3 = arith.constant 0 : index
    %c0_4 = arith.constant 0 : index
    %c0_5 = arith.constant 0 : index
    %2 = vector.load %arg2[%c0_2, %c0_3, %c0_4, %c0_5] : memref<1x4x8x128xf32, #tpu.memory_space<vmem>>, vector<1x1x8x128xf32>
    %3 = vector.shape_cast %2 : vector<1x1x8x128xf32> to vector<8x128xf32>
    %c0_6 = arith.constant 0 : index
    %c1 = arith.constant 1 : index
    %c0_7 = arith.constant 0 : index
    %c0_8 = arith.constant 0 : index
    %4 = vector.load %arg2[%c0_6, %c1, %c0_7, %c0_8] : memref<1x4x8x128xf32, #tpu.memory_space<vmem>>, vector<1x1x8x128xf32>
    %5 = vector.shape_cast %4 : vector<1x1x8x128xf32> to vector<8x128xf32>
    %6 = arith.maximumf %3, %5 : vector<8x128xf32>
    %c0_9 = arith.constant 0 : index
    %c2 = arith.constant 2 : index
    %c0_10 = arith.constant 0 : index
    %c0_11 = arith.constant 0 : index
    %7 = vector.load %arg2[%c0_9, %c2, %c0_10, %c0_11] : memref<1x4x8x128xf32, #tpu.memory_space<vmem>>, vector<1x1x8x128xf32>
    %8 = vector.shape_cast %7 : vector<1x1x8x128xf32> to vector<8x128xf32>
    %9 = arith.maximumf %6, %8 : vector<8x128xf32>
    %c0_12 = arith.constant 0 : index
    %c3 = arith.constant 3 : index
    %c0_13 = arith.constant 0 : index
    %c0_14 = arith.constant 0 : index
    %10 = vector.load %arg2[%c0_12, %c3, %c0_13, %c0_14] : memref<1x4x8x128xf32, #tpu.memory_space<vmem>>, vector<1x1x8x128xf32>
    %11 = vector.shape_cast %10 : vector<1x1x8x128xf32> to vector<8x128xf32>
    %12 = arith.maximumf %9, %11 : vector<8x128xf32>
    %cst = arith.constant 0.000000e+00 : f32
    %13 = vector.broadcast %cst : f32 to vector<8x128xf32>
    %cst_15 = arith.constant 0.000000e+00 : f32
    %14 = vector.broadcast %cst_15 : f32 to vector<8x128xf32>
    %c0_16 = arith.constant 0 : index
    %c0_17 = arith.constant 0 : index
    %c0_18 = arith.constant 0 : index
    %c0_19 = arith.constant 0 : index
    %15 = vector.load %arg2[%c0_16, %c0_17, %c0_18, %c0_19] : memref<1x4x8x128xf32, #tpu.memory_space<vmem>>, vector<1x1x8x128xf32>
    %16 = vector.shape_cast %15 : vector<1x1x8x128xf32> to vector<8x128xf32>
    %17 = arith.subf %16, %12 : vector<8x128xf32>
    %18 = math.exp %17 : vector<8x128xf32>
    %c0_i32 = arith.constant 0 : i32
    %19 = vector.broadcast %c0_i32 : i32 to vector<8x128xi32>
    %20 = arith.cmpi eq, %1, %19 : vector<8x128xi32>
    %21 = arith.select %20, %17, %13 : vector<8x128xi1>, vector<8x128xf32>
    %22 = arith.select %20, %18, %14 : vector<8x128xi1>, vector<8x128xf32>
    %c0_20 = arith.constant 0 : index
    %c1_21 = arith.constant 1 : index
    %c0_22 = arith.constant 0 : index
    %c0_23 = arith.constant 0 : index
    %23 = vector.load %arg2[%c0_20, %c1_21, %c0_22, %c0_23] : memref<1x4x8x128xf32, #tpu.memory_space<vmem>>, vector<1x1x8x128xf32>
    %24 = vector.shape_cast %23 : vector<1x1x8x128xf32> to vector<8x128xf32>
    %25 = arith.subf %24, %12 : vector<8x128xf32>
    %26 = math.exp %25 : vector<8x128xf32>
    %27 = arith.addf %18, %26 : vector<8x128xf32>
    %c1_i32 = arith.constant 1 : i32
    %28 = vector.broadcast %c1_i32 : i32 to vector<8x128xi32>
    %29 = arith.cmpi eq, %1, %28 : vector<8x128xi32>
    %30 = arith.select %29, %25, %21 : vector<8x128xi1>, vector<8x128xf32>
    %31 = arith.select %29, %26, %22 : vector<8x128xi1>, vector<8x128xf32>
    %c0_24 = arith.constant 0 : index
    %c2_25 = arith.constant 2 : index
    %c0_26 = arith.constant 0 : index
    %c0_27 = arith.constant 0 : index
    %32 = vector.load %arg2[%c0_24, %c2_25, %c0_26, %c0_27] : memref<1x4x8x128xf32, #tpu.memory_space<vmem>>, vector<1x1x8x128xf32>
    %33 = vector.shape_cast %32 : vector<1x1x8x128xf32> to vector<8x128xf32>
    %34 = arith.subf %33, %12 : vector<8x128xf32>
    %35 = math.exp %34 : vector<8x128xf32>
    %36 = arith.addf %27, %35 : vector<8x128xf32>
    %c2_i32 = arith.constant 2 : i32
    %37 = vector.broadcast %c2_i32 : i32 to vector<8x128xi32>
    %38 = arith.cmpi eq, %1, %37 : vector<8x128xi32>
    %39 = arith.select %38, %34, %30 : vector<8x128xi1>, vector<8x128xf32>
    %40 = arith.select %38, %35, %31 : vector<8x128xi1>, vector<8x128xf32>
    %c0_28 = arith.constant 0 : index
    %c3_29 = arith.constant 3 : index
    %c0_30 = arith.constant 0 : index
    %c0_31 = arith.constant 0 : index
    %41 = vector.load %arg2[%c0_28, %c3_29, %c0_30, %c0_31] : memref<1x4x8x128xf32, #tpu.memory_space<vmem>>, vector<1x1x8x128xf32>
    %42 = vector.shape_cast %41 : vector<1x1x8x128xf32> to vector<8x128xf32>
    %43 = arith.subf %42, %12 : vector<8x128xf32>
    %44 = math.exp %43 : vector<8x128xf32>
    %45 = arith.addf %36, %44 : vector<8x128xf32>
    %c3_i32 = arith.constant 3 : i32
    %46 = vector.broadcast %c3_i32 : i32 to vector<8x128xi32>
    %47 = arith.cmpi eq, %1, %46 : vector<8x128xi32>
    %48 = arith.select %47, %43, %39 : vector<8x128xi1>, vector<8x128xf32>
    %49 = arith.select %47, %44, %40 : vector<8x128xi1>, vector<8x128xf32>
    %50 = math.log %45 : vector<8x128xf32>
    %51 = arith.subf %50, %48 : vector<8x128xf32>
    %52 = arith.divf %49, %45 : vector<8x128xf32>
    %cst_32 = arith.constant 1.000000e+00 : f32
    %53 = vector.broadcast %cst_32 : f32 to vector<8x128xf32>
    %54 = arith.subf %53, %52 : vector<8x128xf32>
    %cst_33 = arith.constant 0.000000e+00 : f32
    %55 = vector.broadcast %cst_33 : f32 to vector<8x128xf32>
    %56 = arith.maximumf %54, %55 : vector<8x128xf32>
    %57 = arith.mulf %56, %56 : vector<8x128xf32>
    %58 = arith.mulf %57, %51 : vector<8x128xf32>
    %c1_i32_34 = arith.constant 1 : i32
    %59 = vector.broadcast %c1_i32_34 : i32 to vector<8x128xi32>
    %60 = arith.cmpi eq, %1, %59 : vector<8x128xi32>
    %c0_i32_35 = arith.constant 0 : i32
    %61 = vector.broadcast %c0_i32_35 : i32 to vector<8x128xi32>
    %62 = arith.cmpi eq, %1, %61 : vector<8x128xi32>
    %cst_36 = arith.constant 7.500000e-01 : f32
    %cst_37 = arith.constant 1.000000e+00 : f32
    %63 = vector.broadcast %cst_36 : f32 to vector<8x128xf32>
    %64 = vector.broadcast %cst_37 : f32 to vector<8x128xf32>
    %65 = arith.select %62, %63, %64 : vector<8x128xi1>, vector<8x128xf32>
    %cst_38 = arith.constant 2.500000e-01 : f32
    %66 = vector.broadcast %cst_38 : f32 to vector<8x128xf32>
    %67 = arith.select %60, %66, %65 : vector<8x128xi1>, vector<8x128xf32>
    %68 = arith.mulf %67, %58 : vector<8x128xf32>
    %c0_i32_39 = arith.constant 0 : i32
    %69 = vector.broadcast %c0_i32_39 : i32 to vector<8x128xi32>
    %70 = arith.cmpi sge, %1, %69 : vector<8x128xi32>
    %c4_i32 = arith.constant 4 : i32
    %71 = vector.broadcast %c4_i32 : i32 to vector<8x128xi32>
    %72 = arith.cmpi slt, %1, %71 : vector<8x128xi32>
    %73 = arith.andi %70, %72 : vector<8x128xi1>
    %cst_40 = arith.constant 0.000000e+00 : f32
    %74 = vector.broadcast %cst_40 : f32 to vector<8x128xf32>
    %75 = arith.select %73, %68, %74 : vector<8x128xi1>, vector<8x128xf32>
    %76 = vector.shape_cast %75 : vector<8x128xf32> to vector<1x8x128xf32>
    %cst_41 = arith.constant dense<0.000000e+00> : vector<8x128xf32>
    %77 = vector.multi_reduction <add>, %76, %cst_41 [0] : vector<1x8x128xf32> to vector<8x128xf32>
    %c0_42 = arith.constant 0 : index
    %c0_43 = arith.constant 0 : index
    %c0_44 = arith.constant 0 : index
    %78 = vector.load %arg4[%c0_42, %c0_43, %c0_44] : memref<1x8x128xf32, #tpu.memory_space<vmem>>, vector<1x8x128xf32>
    %79 = vector.shape_cast %78 : vector<1x8x128xf32> to vector<8x128xf32>
    %80 = vector.shape_cast %77 : vector<8x128xf32> to vector<1x8x128xf32>
    tpu.vector_store %arg4[%c0_42, %c0_43, %c0_44], %80 {strides = array<i32>} : memref<1x8x128xf32, #tpu.memory_space<vmem>>, vector<1x8x128xf32>,
    return
  }
  func.func @transform_0(%arg0: i32, %arg1: i32) -> (i32, i32, i32, i32) {
    %c0_i32 = arith.constant 0 : i32
    %c0_i32_0 = arith.constant 0 : i32
    %c0_i32_1 = arith.constant 0 : i32
    return %arg0, %c0_i32, %arg1, %c0_i32_0 : i32, i32, i32, i32
  }
  func.func @transform_1(%arg0: i32, %arg1: i32) -> (i32, i32, i32) {
    %c0_i32 = arith.constant 0 : i32
    %c0_i32_0 = arith.constant 0 : i32
    return %arg0, %arg1, %c0_i32 : i32, i32, i32
  }
  func.func @transform_2(%arg0: i32, %arg1: i32) -> (i32, i32, i32) {
    %c0_i32 = arith.constant 0 : i32
    %c0_i32_0 = arith.constant 0 : i32
    return %arg0, %arg1, %c0_i32 : i32, i32, i32
  }
}

</mosaic_0001>

<bundles_post_ra>
// kernel: tpu_custom_call.1
= control target key start
LH: loop header
LB: loop body
LE: loop exit
PB: predicated region body
PF: predicated region fallthrough
CT: control target
= control target key end

     0   :  { %7 = vsyncpa [#allocation3], 0  ;;  %s892_s0 = inlined_call_operand.hbm [shape: f32[2,4,8,128], index: 0, kind: input, shape index: {}]   ;;  %s893_s1 = inlined_call_operand.hbm [shape: s32[2,8,128], index: 1, kind: input, shape index: {}]   ;;  %s894_s2 = inlined_call_operand.hbm [shape: f32[2,8,128], index: 2, kind: output, shape index: {}]  }
   0x1   :  { %9 = vsyncpa [#allocation3 + $0x1], 0 }
   0x2   :  { %10 = vsyncpa [#allocation6], 0 }
   0x3   :  { %12 = vsyncpa [#allocation6 + $0x1], 0 }
   0x4   :  { %13 = vsyncpa [#allocation4], 0 }
   0x5   :  { %15 = vsyncpa [#allocation4 + $0x1], 0  ;;  %s667_s9 = smov 0   ;;  %s669_s10 = smov 0  }
   0x6   :  { %s671_s11 = smov 0   ;;  %s673_s12 = smov 0  }
   0x7   :  { %s675_s13 = smov 0   ;;  %s677_s14 = smov 0  }
   0x8 LB: > { %s395_s15 = sadd.s32 4294967295, %s644_s14   ;;  %s396_s16 = sadd.s32 4294967294, %s644_s14   ;;  %s644_s14 = sphi %s677_s14, %s21_s14   ;;  %s640_s13 = sphi %s675_s13, %s913_s13   ;;  %s636_s12 = sphi %s673_s12, %s912_s12   ;;  %s632_s11 = sphi %s671_s11, %s911_s11   ;;  %s628_s10 = sphi %s669_s10, %s910_s10   ;;  %s624_s9 = sphi %s667_s9, %s909_s9  }
   0x9   : > { %s33_s17 = sadd.s32 1, %s640_s13  ;;  %s42_s18 = sadd.s32 1, %s632_s11 }
   0xa   : > { %p35_p0 = scmp.ge.s32.totalorder %s33_s17, 2  ;;  %p49_p1 = scmp.ne.s32.totalorder %s632_s11, %s628_s10 }
   0xb   : > { %p50_p2 = scmp.eq.s32.totalorder %s644_s14, 0  ;;  %p55_p3 = scmp.ne.s32.totalorder %s628_s10, %s624_s9 }
   0xc   : > { %s915_s17 = smov (%p35_p0, %s33_s17), 0  ;;  %p56_p5 = scmp.eq.s32.totalorder %s395_s15, 0 }
   0xd   : > { %p708_p4 = por %p50_p2, %p49_p1  ;;  %s37_s20 = ssub.s32 %s640_s13, %s915_s17 }
   0xe   : > { %p109_p6 = scmp.eq.s32.totalorder %s395_s15, 1  ;;  %p40_p7 = scmp.eq.s32.totalorder %s37_s20, 0 }
   0xf   : > { %p714_p8 = por %p56_p5, %p55_p3  ;;  %p115_p10 = scmp.eq.s32.totalorder %s396_s16, 1 }
  0x10   : > { %p718_p9 = por %p109_p6, %p49_p1  ;;  %p433_p13 = scmp.lt.s32.totalorder %s644_s14, 2 }
  0x11   : > { %s898_s21 = scalar_select %p714_p8, 1, 0 }
  0x12   : > { %s899_s22 = scalar_select %p718_p9, 1, 0 }
  0x13   : > { %s723_s23 = scalar_select %p40_p7, %s632_s11, %s42_s18  }
  0x14   : > { %p725_p11 = por %p115_p10, %p55_p3  ;;  %s732_s25 = sand.u32 1, %s632_s11  }
  0x15   : > { %s399_s26 = sshll.u32 %s732_s25, 5  ;;  %s415_s27 = sshll.u32 %s640_s13, 9 }
  0x16   : > { %s900_s24 = scalar_select %p725_p11, 1, 0 }
  0x17   : > { %s739_s30 = scalar_lea.hbm %s892_s0, %s415_s27  ;;  %s139_s3 = scalar_lea.vmem [#allocation2], %s399_s26 }
  0x18   : > { %s147_s4 = sshll.u32 %s139_s3, 4  ;;  %p745_p0 = pnand %p433_p13, %p708_p4  ;;  %s741_s4 = int_to_ptr.vmem [resolvable:$true] %s147_s4 }
  0x19   : > { %s136_s6 = scalar_lea.sflag [#allocation3], %s732_s25  ;;  %s498_s7 = scalar_lea.hbm %s739_s30, 512 }
  0x1a   : > { %p499_p2 = scmp.ne.s32.totalorder %s739_s30, %s498_s7  ;;  %p500_p3 = pneg %p745_p0 }
  0x1b   : > { %s503_s16 = scalar_lea.hbm %s892_s0, 1024  ;;  %p504_p4 = scmp.lt.u32.totalorder %s739_s30, %s892_s0 }
  0x1c   : > { %p501_p5 = pnand %p500_p3, %p499_p2  ;;  %p505_p7 = scmp.lt.u32.totalorder %s503_s16, %s498_s7 }
  0x1d   : > { %p507_p13 = scmp.lt.u32.totalorder %s498_s7, %s739_s30 }
  0x1e   : > { %p502_p6 = pneg %p501_p5  ;;  %p506_p10 = por %p505_p7, %p504_p4 }
  0x20   : > { %p508_p12 = por %p507_p13, %p506_p10 }
  0x22   : > { %p509_p1 = pnand %p508_p12, %p502_p6 }
  0x24   : > { %512 = shalt.err (!%p509_p1)
}
  0x25   : > { %s513_s20 = scalar_lea.vmem %s741_s4, 512  ;;  %s646_s26 = smov [#allocation2]  }
  0x26   : > { %p514_p2 = scmp.ne.s32.totalorder %s741_s4, %s513_s20  ;;  %s518_s27 = sshll.u32 %s646_s26, 4  ;;  %s519_s27 = int_to_ptr.vmem [resolvable:$false] %s518_s27 }
  0x27   : > { %s520_s28 = scalar_lea.vmem %s519_s27, 1024  ;;  %p521_p9 = scmp.lt.s32.totalorder %s741_s4, %s519_s27 }
  0x28   : > { %p516_p5 = pnand %p514_p2, %p500_p3  ;;  %p522_p4 = scmp.lt.s32.totalorder %s520_s28, %s513_s20 }
  0x2a   : > { %p517_p11 = pneg %p516_p5  ;;  %p523_p7 = por %p522_p4, %p521_p9 }
  0x2c   : > { %p524_p10 = pnand %p523_p7, %p517_p11 }
  0x2e   : > { %527 = shalt.err (!%p524_p10)
}
  0x2f   : > { %s647_s29 = smov 128   ;;  %s648_s3 = smov 8  }
  0x30   : > { %425 = dma.hbm_to_vmem [thread:$0]  (!%p745_p0), %s739_s30, 512, %s741_s4, %s136_s6, %s647_s29, %s647_s29, %s648_s3  }
  0x31   : > { %p174_p12 = scmp.lt.s32.totalorder %s644_s14, 3  ;;  %s402_s7 = sshll.u32 %s732_s25, 3 }
  0x32   : > { %s403_s8 = sshll.u32 %s640_s13, 7  ;;  %p902_p9 = scmp.ge.s32.totalorder %s644_s14, 1 }
  0x33   : > { %s790_s19 = scalar_lea.hbm %s893_s1, %s403_s8  ;;  %s161_s20 = scalar_lea.vmem [#allocation5], %s402_s7 }
  0x34   : > { %p783_p11 = pnand %p902_p9, %p174_p12  ;;  %s169_s26 = sshll.u32 %s161_s20, 4  ;;  %s170_s26 = int_to_ptr.vmem [resolvable:$true] %s169_s26 }
  0x35   : > { %s158_s30 = scalar_lea.sflag [#allocation6], %s732_s25  ;;  %s528_s4 = scalar_lea.hbm %s790_s19, 128 }
  0x36   : > { %s903_s15 = scalar_select %p783_p11, 1, 0 }
  0x37   : > { %p529_p1 = scmp.ne.s32.totalorder %s790_s19, %s528_s4  ;;  %s533_s28 = scalar_lea.hbm %s893_s1, 256 }
  0x38   : > { %p534_p2 = scmp.lt.u32.totalorder %s790_s19, %s893_s1  ;;  %p535_p5 = scmp.lt.u32.totalorder %s533_s28, %s528_s4 }
  0x39   : > { %p531_p6 = pnand %p529_p1, %p500_p3  ;;  %p537_p7 = scmp.lt.u32.totalorder %s528_s4, %s790_s19 }
  0x3a   : > { %p536_p4 = por %p535_p5, %p534_p2 }
  0x3b   : > { %p532_p13 = pneg %p531_p6 }
  0x3c   : > { %p538_p10 = por %p537_p7, %p536_p4 }
  0x3e   : > { %p539_p12 = pnand %p538_p10, %p532_p13 }
  0x40   : > { %542 = shalt.err (!%p539_p12)
}
  0x41   : > { %s543_s25 = scalar_lea.vmem %s170_s26, 128  ;;  %s649_s7 = smov [#allocation5]  }
  0x42   : > { %p544_p9 = scmp.ne.s32.totalorder %s170_s26, %s543_s25  ;;  %s548_s8 = sshll.u32 %s649_s7, 4  ;;  %s549_s8 = int_to_ptr.vmem [resolvable:$false] %s548_s8 }
  0x43   : > { %s550_s16 = scalar_lea.vmem %s549_s8, 256  ;;  %p551_p8 = scmp.lt.s32.totalorder %s170_s26, %s549_s8 }
  0x44   : > { %p546_p1 = pnand %p544_p9, %p500_p3  ;;  %p552_p11 = scmp.lt.s32.totalorder %s550_s16, %s543_s25 }
  0x46   : > { %p547_p6 = pneg %p546_p1  ;;  %p553_p2 = por %p552_p11, %p551_p8 }
  0x48   : > { %p554_p5 = pnand %p553_p2, %p547_p6 }
  0x4a   : > { %557 = shalt.err (!%p554_p5)
}
  0x4b   : > { %428 = dma.hbm_to_vmem [thread:$0]  (!%p745_p0), %s790_s19, 128, %s170_s26, %s158_s30  }
  0x4c   : > { %p904_p13 = scmp.ne.s32.totalorder %s903_s15, 0 }
  0x4d   : > { %s815_s18 = sand.u32 (!%p904_p13), 1, %s628_s10   ;;  %p905_p3 = scmp.ne.s32.totalorder (!%p904_p13), %s898_s21, 0 }
  0x4e   : > { %178 = sbr.rel (%p904_p13) target bundleno = 157 (0x9d), region = 28  ;;  %s405_s20 = sshll.u32 (!%p904_p13), %s815_s18, 5 }
  0x4f   : > { %s181_s4 = scalar_lea.sflag (!%p904_p13), [#allocation3], %s815_s18  ;;  %s184_s6 = scalar_lea.vmem (!%p904_p13), [#allocation2], %s405_s20 }
  0x55   : > { %611 = dma.done.wait (%p905_p3), %s181_s4, 512  }
  0x56   : > { %613 = vsyncadd (%p905_p3), %s181_s4, 4294966784  ;;  %s406_s5 = sshll.u32 %s815_s18, 3  ;;  %s190_s15 = scalar_lea.sflag [#allocation6], %s815_s18 }
  0x57   : > { %s193_s19 = scalar_lea.vmem [#allocation5], %s406_s5 }
  0x58   : > { %615 = dma.done.wait (%p905_p3), %s190_s15, 128  }
  0x59   : > { %617 = vsyncadd (%p905_p3), %s190_s15, 4294967168  ;;  %v220_v0 = vld [vmem:[%s184_s6] sm:$0xff]  ;;  %v408_v1 = vld [vmem:[%s184_s6 + $0x8] sm:$0xff]  ;;  %v650_v38 = vmov 1.0   ;;  %s218_s21 = scalar_lea.vmem [#allocation7], %s406_s5  ;;  %s412_s30 = sshll.u32 %s636_s12, 7 }
  0x5a   : > { %v223_v2 = vmax.f32 %v220_v0, %v408_v1  ;;  %v409_v3 = vld [vmem:[%s184_s6 + $0x10] sm:$0xff]  ;;  %v410_v4 = vld [vmem:[%s184_s6 + $0x18] sm:$0xff]  ;;  %v219_v18 = vld [vmem:[%s193_s19] sm:$0xff]  ;;  %s290_s26 = sshll.u32 %s218_s21, 4  ;;  %s845_s29 = scalar_lea.hbm %s894_s2, %s412_s30  ;;  %s840_s26 = int_to_ptr.vmem [resolvable:$true] %s290_s26 }
  0x5b   : > { %vm233_vm0 = vcmp.eq.s32.totalorder %v219_v18, 0  ;;  %vm240_vm1 = vcmp.eq.s32.totalorder %v219_v18, 1  ;;  %vm247_vm2 = vcmp.eq.s32.totalorder %v219_v18, 2  ;;  %vm254_vm3 = vcmp.eq.s32.totalorder %v219_v18, 3  ;;  %s276_s3 = scalar_lea.sflag [#allocation4], %s815_s18  ;;  %s558_s25 = scalar_lea.vmem %s840_s26, 128 }
  0x5c   : > { %v226_v5 = vmax.f32 %v223_v2, %v409_v3  ;;  %v266_v39 = vsel %vm233_vm0, 0.75, %v650_v38  ;;  %vm269_vm4 = vcmp.ge.s32.totalorder %v219_v18, 0  ;;  %vm270_vm5 = vcmp.lt.s32.totalorder %v219_v18, 4  ;;  %p559_p8 = scmp.ne.s32.totalorder %s840_s26, %s558_s25  ;;  %p906_p0 = scmp.ne.s32.totalorder %s899_s22, 0 }
  0x5d   : > { %v267_v41 = vsel %vm240_vm1, 0.25, %v266_v39  ;;  %vm271_vm6 = vmand %vm269_vm4, %vm270_vm5  ;;  %s651_s12 = smov [#allocation7]  }
  0x5e   : > { %v229_v6 = vmax.f32 %v226_v5, %v410_v4  ;;  %p560_p11 = pnand %p559_p8, %p906_p0  ;;  %s562_s7 = sshll.u32 %s651_s12, 4  ;;  %s563_s7 = int_to_ptr.vmem [resolvable:$false] %s562_s7 }
  0x5f   : > { %s564_s8 = scalar_lea.vmem %s563_s7, 256  ;;  %p565_p7 = scmp.lt.s32.totalorder %s840_s26, %s563_s7 }
  0x60   : > { %v230_v7 = vsub.f32 %v220_v0, %v229_v6  ;;  %v236_v8 = vsub.f32 %v408_v1, %v229_v6  ;;  %v243_v9 = vsub.f32 %v409_v3, %v229_v6  ;;  %v250_v10 = vsub.f32 %v410_v4, %v229_v6  ;;  %p561_p4 = pneg %p560_p11  ;;  %p566_p10 = scmp.lt.s32.totalorder %s564_s8, %s558_s25 }
  0x62   : > { %v231_v11 = vmul.f32 1.442695, %v230_v7  ;;  %v237_v12 = vmul.f32 1.442695, %v236_v8  ;;  %v244_v13 = vmul.f32 1.442695, %v243_v9  ;;  %p567_p12 = por %p566_p10, %p565_p7 }
  0x63   : > { %v251_v14 = vmul.f32 1.442695, %v250_v10  ;;  %v234_v25 = vsel %vm233_vm0, %v230_v7, 0.0 }
  0x64   : > { %486 = vpow2.f32 %v231_v11  ;;  %v241_v27 = vsel %vm240_vm1, %v236_v8, %v234_v25  ;;  %p568_p9 = pnand %p567_p12, %p561_p4 }
  0x65   : > { %488 = vpow2.f32 %v237_v12  ;;  %v248_v30 = vsel %vm247_vm2, %v243_v9, %v241_v27 }
  0x66   : > { %490 = vpow2.f32 %v244_v13  ;;  %v255_v34 = vsel %vm254_vm3, %v250_v10, %v248_v30 }
  0x67   : > { %492 = vpow2.f32 %v251_v14 }
  0x6e   : > { %v487_v15 = vpop.eup %486 }
  0x6f   : > { %v489_v16 = vpop.eup %488  ;;  %v235_v23 = vsel %vm233_vm0, %v487_v15, 0.0 }
  0x70   : > { %v491_v17 = vpop.eup %490  ;;  %v239_v19 = vadd.f32 %v489_v16, %v487_v15  ;;  %v242_v24 = vsel %vm240_vm1, %v489_v16, %v235_v23 }
  0x71   : > { %v493_v20 = vpop.eup %492  ;;  %v249_v26 = vsel %vm247_vm2, %v491_v17, %v242_v24 }
  0x72   : > { %v246_v21 = vadd.f32 %v491_v17, %v239_v19  ;;  %v256_v28 = vsel %vm254_vm3, %v493_v20, %v249_v26 }
  0x74   : > { %v253_v22 = vadd.f32 %v493_v20, %v246_v21 }
  0x76   : > { %494 = vlog2.f32 %v253_v22 }
  0x77   : > { %496 = vrcp.f32 %v253_v22 }
  0x80   : > { %v495_v29 = vpop.eup %494 }
  0x81   : > { %v497_v31 = vpop.eup %496  ;;  %v258_v32 = vmul.f32 0.6931472, %v495_v29 }
  0x82   : > { %v261_v33 = vmul.f32 %v497_v31, %v256_v28 }
  0x83   : > { %v259_v36 = vsub.f32 %v258_v32, %v255_v34 }
  0x84   : > { %v262_v35 = vsub.f32 1.0, %v261_v33 }
  0x86   : > { %v263_v37 = vmax.f32 %v262_v35, 0.0 }
  0x88   : > { %v264_v40 = vmul.f32 %v263_v37, %v263_v37 }
  0x8a   : > { %v265_v42 = vmul.f32 %v264_v40, %v259_v36 }
  0x8c   : > { %v268_v43 = vmul.f32 %v267_v41, %v265_v42 }
  0x8e   : > { %v272_v44 = vsel %vm271_vm6, %v268_v43, 0.0 }
  0x8f   : > { %274 = vst [vmem:[%s218_s21] sm:$0xff] %v272_v44 }
  0x90   : > { %571 = shalt.err (!%p568_p9)
}
  0x91   : > { %s572_s16 = scalar_lea.hbm %s845_s29, 128  ;;  %s576_s4 = scalar_lea.hbm %s894_s2, 256 }
  0x92   : > { %p573_p1 = scmp.ne.s32.totalorder %s845_s29, %s572_s16  ;;  %p577_p5 = scmp.lt.u32.totalorder %s845_s29, %s894_s2 }
  0x93   : > { %p578_p13 = scmp.lt.u32.totalorder %s576_s4, %s572_s16  ;;  %p580_p8 = scmp.lt.u32.totalorder %s572_s16, %s845_s29 }
  0x94   : > { %p574_p6 = pnand %p573_p1, %p906_p0 }
  0x95   : > { %p579_p3 = por %p578_p13, %p577_p5 }
  0x96   : > { %p575_p2 = pneg %p574_p6 }
  0x97   : > { %p581_p11 = por %p580_p8, %p579_p3 }
  0x99   : > { %p582_p4 = pnand %p581_p11, %p575_p2 }
  0x9b   : > { %585 = shalt.err (!%p582_p4)
}
  0x9c   : > { %420 = dma.vmem_to_hbm [thread:$0]  (%p906_p0), %s840_s26, 128, %s845_s29, %s276_s3  }
  0x9d PF: > { %s302_s15 = sand.u32 1, %s624_s9   ;;  %p907_p7 = scmp.ne.s32.totalorder %s900_s24, 0 }
  0x9e   : > { %p908_p10 = scmp.ge.s32.totalorder %s644_s14, 2  ;;  %s303_s19 = scalar_lea.sflag [#allocation4], %s302_s15 }
  0xa0   : > { %p430_p12 = pnand %p908_p10, %p907_p7 }
  0xa2   : > { %619 = dma.done.wait (!%p430_p12), %s303_s19, 128  }
  0xa3   : > { %621 = vsyncadd (!%p430_p12), %s303_s19, 4294967168  ;;  %s21_s14 = sadd.s32 1, %s644_s14   ;;  %s909_s9 = smov %s628_s10 }
  0xa4   : > { %p18_p9 = scmp.ge.s32.totalorder %s21_s14, 4   ;;  %s910_s10 = smov %s632_s11 }
  0xa5   : > { %s911_s11 = smov %s723_s23  ;;  %s912_s12 = smov %s640_s13 }
  0xa6   : > { %s913_s13 = smov %s915_s17  ;;  %20 = sbr.rel (!%p18_p9) target bundleno = 8 (0x8), region = 89 }
  0xad   :  { %308 = vsyncpa [#allocation3], 1 }
  0xae   :  { %310 = vsyncpa [#allocation3 + $0x1], 1 }
  0xaf   :  { %311 = vsyncpa [#allocation6], 1 }
  0xb0   :  { %313 = vsyncpa [#allocation6 + $0x1], 1 }
  0xb1   :  { %314 = vsyncpa [#allocation4], 1 }
  0xb2   :  { %316 = vsyncpa [#allocation4 + $0x1], 1 }

</bundles_post_ra>
